<compile_context>
chip_gen: v6e
topology: v6e:2x2x1
jax: 0.10.0
libtpu: 0.0.40
codegen_flags: <defaults>
</compile_context>

<pallas_src>
import jax
import jax.numpy as jnp
from jax.experimental import pallas as pl
from jax.experimental.pallas import tpu as pltpu

EMBED_DIM = 64        # settings.embedding_dim
NUM_FEATS = 5
NUM_FEATS_PAD = 8     # padded to the f32 sublane quantum
H1 = 256              # watched/liked hidden
P1 = 128              # watched/liked projection out
H2 = 64               # numerical hidden
P2 = 32               # numerical projection out
CAT = 2 * P1 + P2     # 288
LN_EPS = 1e-5
MAX_TB = 1024                 # max batch-tile rows
MEGACORE_SPLIT_ROWS = 256     # force >=2 grid steps once the batch is this big


def _round_up(x, m):
    return (x + m - 1) // m * m


def _cdiv(a, b):
    return -(-a // b)


def user_embedding_kernel(
    we_ref, le_ref, nf_ref,                       # activations (f32): [TB,64], [TB,64], [TB,8]
    ww1_ref, wb1_ref,                             # watched  Linear(64,256)
    lw1_ref, lb1_ref,                             # liked    Linear(64,256)
    nw1_ref, nb1_ref,                             # numerical Linear(5->8 padded, 64)
    wf2_ref, lf2_ref, nf2_ref,                    # folded second-layer @ final weights
    fb_ref,                                       # fused final bias
    lng_ref, lnb_ref,                             # LayerNorm gamma / beta
    out_ref,                                      # [TB, 64] f32
):
    bf16 = jnp.bfloat16
    f32 = jnp.float32

    we = we_ref[...].astype(bf16)
    le = le_ref[...].astype(bf16)
    nf = nf_ref[...].astype(bf16)

    # First layers + ReLU (Dropout = identity at inference).
    hw = jnp.dot(we, ww1_ref[...], preferred_element_type=f32) + wb1_ref[...]
    hw = jnp.maximum(hw, 0.0).astype(bf16)                                   # [TB,256]
    hl = jnp.dot(le, lw1_ref[...], preferred_element_type=f32) + lb1_ref[...]
    hl = jnp.maximum(hl, 0.0).astype(bf16)                                   # [TB,256]
    hn = jnp.dot(nf, nw1_ref[...], preferred_element_type=f32) + nb1_ref[...]
    hn = jnp.maximum(hn, 0.0).astype(bf16)                                   # [TB,64]

    # Folded (second layer @ final Linear) per branch + fused bias.
    y = (jnp.dot(hw, wf2_ref[...], preferred_element_type=f32)
         + jnp.dot(hl, lf2_ref[...], preferred_element_type=f32)
         + jnp.dot(hn, nf2_ref[...], preferred_element_type=f32)
         + fb_ref[...])                                                      # [TB,64]

    # LayerNorm over the last dim, f32 throughout; rsqrt routes to the EUP.
    mean = jnp.mean(y, axis=-1, keepdims=True)
    centered = y - mean
    var = jnp.mean(centered * centered, axis=-1, keepdims=True)
    normed = centered * jax.lax.rsqrt(var + LN_EPS)
    out_ref[...] = normed * lng_ref[...] + lnb_ref[...]


def prepare_params(params):
    """One-time weight preprocessing.

    * Fold W2 @ final-linear slice per branch (f32 fold, single bf16 cast).
    * Fold second-layer biases into the final bias.
    * Pad the numerical first-layer weight K: 5 -> 8 with zero rows.
    """
    (ww1, wb1, ww2, wb2,
     lw1, lb1, lw2, lb2,
     nw1, nb1, nw2, nb2,
     fw, fb, ln_g, ln_b) = params
    bf16 = jnp.bfloat16

    fw_w = fw[:P1, :]              # [128, 64]
    fw_l = fw[P1:2 * P1, :]        # [128, 64]
    fw_n = fw[2 * P1:, :]          # [32, 64]

    wf2 = ww2 @ fw_w               # [256, 64] f32
    lf2 = lw2 @ fw_l               # [256, 64] f32
    nf2 = nw2 @ fw_n               # [64, 64]  f32
    fb_fused = fb + wb2 @ fw_w + lb2 @ fw_l + nb2 @ fw_n   # [1, 64] f32

    nw1_pad = (jnp.zeros((NUM_FEATS_PAD, H2), jnp.float32)
               .at[:NUM_FEATS, :].set(nw1))                # [8, 64]

    return (ww1.astype(bf16), wb1,
            lw1.astype(bf16), lb1,
            nw1_pad.astype(bf16), nb1,
            wf2.astype(bf16), lf2.astype(bf16), nf2.astype(bf16),
            fb_fused, ln_g, ln_b)


@jax.jit
def user_embedding_forward(watched_embedding, liked_embedding, numerical_features, prepped):
    batch = watched_embedding.shape[0]
    b_pad8 = _round_up(max(batch, 1), 8)

    # Tile choice: amortize per-step overhead (big tiles), keep padding to at
    # most ~one sublane group, and give v7x megacore >=2 grid steps once the
    # batch is large enough for the split to be worthwhile.
    n_tiles = max(_cdiv(b_pad8, MAX_TB), 1)
    if b_pad8 >= 2 * MEGACORE_SPLIT_ROWS:
        n_tiles = max(n_tiles, 2)
    tb = _round_up(_cdiv(b_pad8, n_tiles), 8)
    n_tiles = _cdiv(b_pad8, tb)
    b_pad = tb * n_tiles

    # Minimal wrapper work: watched/liked are passed raw (cast to bf16 happens
    # in-kernel); only the tiny numerical slab gets lane-padded 5 -> 8.
    nf = (jnp.zeros((b_pad, NUM_FEATS_PAD), jnp.float32)
          .at[:batch, :NUM_FEATS].set(numerical_features))
    we = watched_embedding
    le = liked_embedding
    if b_pad != batch:
        we = jnp.pad(we, ((0, b_pad - batch), (0, 0)))
        le = jnp.pad(le, ((0, b_pad - batch), (0, 0)))

    weights = prepped  # 12 arrays

    def act_spec(width):
        return pl.BlockSpec((tb, width), lambda i: (i, 0))

    def weight_spec(arr):
        return pl.BlockSpec(arr.shape, lambda i: (0, 0))   # VMEM-resident across batch tiles

    out = pl.pallas_call(
        user_embedding_kernel,
        out_shape=jax.ShapeDtypeStruct((b_pad, EMBED_DIM), jnp.float32),
        grid_spec=pltpu.PrefetchScalarGridSpec(
            num_scalar_prefetch=0,
            grid=(n_tiles,),
            in_specs=[act_spec(EMBED_DIM), act_spec(EMBED_DIM), act_spec(NUM_FEATS_PAD)]
                     + [weight_spec(w) for w in weights],
            out_specs=pl.BlockSpec((tb, EMBED_DIM), lambda i: (i, 0)),
        ),
        compiler_params=pltpu.CompilerParams(
            dimension_semantics=("parallel",)),   # megacore batch split on v7x
    )(we, le, nf, *weights)
    return out[:batch]


def init_params(key):
    """Deterministic init mimicking PyTorch Linear default (uniform +-1/sqrt(fan_in))."""
    def linear(key, fan_in, fan_out):
        kw, kb = jax.random.split(key)
        bound = 1.0 / jnp.sqrt(float(fan_in))
        w = jax.random.uniform(kw, (fan_in, fan_out), jnp.float32, -bound, bound)
        b = jax.random.uniform(kb, (1, fan_out), jnp.float32, -bound, bound)
        return w, b

    keys = jax.random.split(key, 7)
    ww1, wb1 = linear(keys[0], EMBED_DIM, H1)
    ww2, wb2 = linear(keys[1], H1, P1)
    lw1, lb1 = linear(keys[2], EMBED_DIM, H1)
    lw2, lb2 = linear(keys[3], H1, P1)
    nw1, nb1 = linear(keys[4], NUM_FEATS, H2)
    nw2, nb2 = linear(keys[5], H2, P2)
    fw, fb = linear(keys[6], CAT, EMBED_DIM)
    ln_g = jnp.ones((1, EMBED_DIM), jnp.float32)
    ln_b = jnp.zeros((1, EMBED_DIM), jnp.float32)
    return (ww1, wb1, ww2, wb2,
            lw1, lb1, lw2, lb2,
            nw1, nb1, nw2, nb2,
            fw, fb, ln_g, ln_b)


def reference_forward(we, le, nf, params):
    """Unfused f32 reference matching the PyTorch module (dropout = identity)."""
    (ww1, wb1, ww2, wb2,
     lw1, lb1, lw2, lb2,
     nw1, nb1, nw2, nb2,
     fw, fb, ln_g, ln_b) = params

    def mlp(x, w1, b1, w2, b2):
        return jnp.maximum(x @ w1 + b1, 0.0) @ w2 + b2

    combined = jnp.concatenate(
        [mlp(we, ww1, wb1, ww2, wb2),
         mlp(le, lw1, lb1, lw2, lb2),
         mlp(nf, nw1, nb1, nw2, nb2)], axis=-1)
    y = combined @ fw + fb
    mean = jnp.mean(y, axis=-1, keepdims=True)
    var = jnp.mean((y - mean) ** 2, axis=-1, keepdims=True)
    return (y - mean) / jnp.sqrt(var + LN_EPS) * ln_g + ln_b


def reference_forward_bf16(we, le, nf, prepped):
    """bf16-weight reference mirroring the kernel math exactly (tight tolerance)."""
    (ww1, wb1, lw1, lb1, nw1p, nb1, wf2, lf2, nf2, fb_fused, ln_g, ln_b) = prepped
    bf16, f32 = jnp.bfloat16, jnp.float32

    def dot(a, b):
        return jnp.dot(a, b, preferred_element_type=f32)

    nf_p = jnp.zeros((we.shape[0], NUM_FEATS_PAD), f32).at[:, :NUM_FEATS].set(nf)
    hw = jnp.maximum(dot(we.astype(bf16), ww1) + wb1, 0.0).astype(bf16)
    hl = jnp.maximum(dot(le.astype(bf16), lw1) + lb1, 0.0).astype(bf16)
    hn = jnp.maximum(dot(nf_p.astype(bf16), nw1p) + nb1, 0.0).astype(bf16)
    y = dot(hw, wf2) + dot(hl, lf2) + dot(hn, nf2) + fb_fused
    mean = jnp.mean(y, axis=-1, keepdims=True)
    c = y - mean
    var = jnp.mean(c * c, axis=-1, keepdims=True)
    return c * jax.lax.rsqrt(var + LN_EPS) * ln_g + ln_b


if __name__ == "__main__":
    key = jax.random.PRNGKey(0)
    k_params, k_we, k_le, k_nf = jax.random.split(key, 4)

    batch = 8
    watched_embedding = jax.random.normal(k_we, (batch, EMBED_DIM), jnp.float32)
    liked_embedding = jax.random.normal(k_le, (batch, EMBED_DIM), jnp.float32)
    numerical_features = jax.random.normal(k_nf, (batch, NUM_FEATS), jnp.float32)

    params = init_params(k_params)
    prepped = prepare_params(params)

    out = user_embedding_forward(watched_embedding, liked_embedding,
                                 numerical_features, prepped)
    out = jax.block_until_ready(out)
    assert out.shape == (batch, EMBED_DIM)

    # Loose check vs the f32 reference (bf16 MXU operands -> loosened tolerance).
    ref_f32 = reference_forward(watched_embedding, liked_embedding,
                                numerical_features, params)
    assert jnp.allclose(out, ref_f32, atol=8e-2, rtol=8e-2), "mismatch vs f32 reference"

    # Tight check vs a bf16-weight reference mirroring the kernel math.
    ref_bf16 = reference_forward_bf16(watched_embedding, liked_embedding,
                                      numerical_features, prepped)
    assert jnp.allclose(out, ref_bf16, atol=1e-2, rtol=1e-2), "mismatch vs bf16 reference"

    print("KERNEL_OK")
</pallas_src>

<mosaic_0001>
module attributes {stable_mosaic.version = 11 : i64} {
  func.func @user_embedding_kernel(%arg0: i32, %arg1: memref<8x64xf32, #tpu.memory_space<vmem>>, %arg2: memref<8x64xf32, #tpu.memory_space<vmem>>, %arg3: memref<8x8xf32, #tpu.memory_space<vmem>>, %arg4: memref<64x256xbf16, #tpu.memory_space<vmem>>, %arg5: memref<1x256xf32, #tpu.memory_space<vmem>>, %arg6: memref<64x256xbf16, #tpu.memory_space<vmem>>, %arg7: memref<1x256xf32, #tpu.memory_space<vmem>>, %arg8: memref<8x64xbf16, #tpu.memory_space<vmem>>, %arg9: memref<1x64xf32, #tpu.memory_space<vmem>>, %arg10: memref<256x64xbf16, #tpu.memory_space<vmem>>, %arg11: memref<256x64xbf16, #tpu.memory_space<vmem>>, %arg12: memref<64x64xbf16, #tpu.memory_space<vmem>>, %arg13: memref<1x64xf32, #tpu.memory_space<vmem>>, %arg14: memref<1x64xf32, #tpu.memory_space<vmem>>, %arg15: memref<1x64xf32, #tpu.memory_space<vmem>>, %arg16: memref<8x64xf32, #tpu.memory_space<vmem>>) attributes {dimension_semantics = [#tpu.dimension_semantics<parallel>], iteration_bounds = array<i64: 1>, scalar_prefetch = 0 : i64, scratch_operands = 0 : i64, tpu.core_type = #tpu.core_type<tc>, window_params = [{transform_indices = @transform_0, window_bounds = array<i64: 8, 64>}, {transform_indices = @transform_1, window_bounds = array<i64: 8, 64>}, {transform_indices = @transform_2, window_bounds = array<i64: 8, 8>}, {pipeline_mode = #tpu.pipeline_mode<synchronous>, transform_indices = @transform_3, window_bounds = array<i64: 64, 256>}, {pipeline_mode = #tpu.pipeline_mode<synchronous>, transform_indices = @transform_4, window_bounds = array<i64: 1, 256>}, {pipeline_mode = #tpu.pipeline_mode<synchronous>, transform_indices = @transform_5, window_bounds = array<i64: 64, 256>}, {pipeline_mode = #tpu.pipeline_mode<synchronous>, transform_indices = @transform_6, window_bounds = array<i64: 1, 256>}, {pipeline_mode = #tpu.pipeline_mode<synchronous>, transform_indices = @transform_7, window_bounds = array<i64: 8, 64>}, {pipeline_mode = #tpu.pipeline_mode<synchronous>, transform_indices = @transform_8, window_bounds = array<i64: 1, 64>}, {pipeline_mode = #tpu.pipeline_mode<synchronous>, transform_indices = @transform_9, window_bounds = array<i64: 256, 64>}, {pipeline_mode = #tpu.pipeline_mode<synchronous>, transform_indices = @transform_10, window_bounds = array<i64: 256, 64>}, {pipeline_mode = #tpu.pipeline_mode<synchronous>, transform_indices = @transform_11, window_bounds = array<i64: 64, 64>}, {pipeline_mode = #tpu.pipeline_mode<synchronous>, transform_indices = @transform_12, window_bounds = array<i64: 1, 64>}, {pipeline_mode = #tpu.pipeline_mode<synchronous>, transform_indices = @transform_13, window_bounds = array<i64: 1, 64>}, {pipeline_mode = #tpu.pipeline_mode<synchronous>, transform_indices = @transform_14, window_bounds = array<i64: 1, 64>}, {transform_indices = @transform_15, window_bounds = array<i64: 8, 64>}]} {
    %c0 = arith.constant 0 : index
    %c0_0 = arith.constant 0 : index
    %0 = vector.load %arg1[%c0, %c0_0] : memref<8x64xf32, #tpu.memory_space<vmem>>, vector<8x64xf32>
    %1 = arith.truncf %0 : vector<8x64xf32> to vector<8x64xbf16>
    %c0_1 = arith.constant 0 : index
    %c0_2 = arith.constant 0 : index
    %2 = vector.load %arg2[%c0_1, %c0_2] : memref<8x64xf32, #tpu.memory_space<vmem>>, vector<8x64xf32>
    %3 = arith.truncf %2 : vector<8x64xf32> to vector<8x64xbf16>
    %c0_3 = arith.constant 0 : index
    %c0_4 = arith.constant 0 : index
    %4 = vector.load %arg3[%c0_3, %c0_4] : memref<8x8xf32, #tpu.memory_space<vmem>>, vector<8x8xf32>
    %5 = arith.truncf %4 : vector<8x8xf32> to vector<8x8xbf16>
    %c0_5 = arith.constant 0 : index
    %c0_6 = arith.constant 0 : index
    %6 = vector.load %arg4[%c0_5, %c0_6] : memref<64x256xbf16, #tpu.memory_space<vmem>>, vector<64x256xbf16>
    %cst = arith.constant dense<0.000000e+00> : vector<8x256xf32>
    %7 = tpu.matmul %1, %6, %cst {dimension_numbers = #tpu.dot_dimension_numbers<[1], [0], [0], [1], [0, 0, 1, 1], [], []>} : vector<8x64xbf16>, vector<64x256xbf16>, vector<8x256xf32> -> vector<8x256xf32>
    %c0_7 = arith.constant 0 : index
    %c0_8 = arith.constant 0 : index
    %8 = vector.load %arg5[%c0_7, %c0_8] : memref<1x256xf32, #tpu.memory_space<vmem>>, vector<1x256xf32>
    %9 = vector.broadcast %8 : vector<1x256xf32> to vector<8x256xf32>
    %10 = arith.addf %7, %9 : vector<8x256xf32>
    %cst_9 = arith.constant 0.000000e+00 : f32
    %11 = vector.broadcast %cst_9 : f32 to vector<8x256xf32>
    %12 = arith.maximumf %10, %11 : vector<8x256xf32>
    %13 = arith.truncf %12 : vector<8x256xf32> to vector<8x256xbf16>
    %c0_10 = arith.constant 0 : index
    %c0_11 = arith.constant 0 : index
    %14 = vector.load %arg6[%c0_10, %c0_11] : memref<64x256xbf16, #tpu.memory_space<vmem>>, vector<64x256xbf16>
    %cst_12 = arith.constant dense<0.000000e+00> : vector<8x256xf32>
    %15 = tpu.matmul %3, %14, %cst_12 {dimension_numbers = #tpu.dot_dimension_numbers<[1], [0], [0], [1], [0, 0, 1, 1], [], []>} : vector<8x64xbf16>, vector<64x256xbf16>, vector<8x256xf32> -> vector<8x256xf32>
    %c0_13 = arith.constant 0 : index
    %c0_14 = arith.constant 0 : index
    %16 = vector.load %arg7[%c0_13, %c0_14] : memref<1x256xf32, #tpu.memory_space<vmem>>, vector<1x256xf32>
    %17 = vector.broadcast %16 : vector<1x256xf32> to vector<8x256xf32>
    %18 = arith.addf %15, %17 : vector<8x256xf32>
    %cst_15 = arith.constant 0.000000e+00 : f32
    %19 = vector.broadcast %cst_15 : f32 to vector<8x256xf32>
    %20 = arith.maximumf %18, %19 : vector<8x256xf32>
    %21 = arith.truncf %20 : vector<8x256xf32> to vector<8x256xbf16>
    %c0_16 = arith.constant 0 : index
    %c0_17 = arith.constant 0 : index
    %22 = vector.load %arg8[%c0_16, %c0_17] : memref<8x64xbf16, #tpu.memory_space<vmem>>, vector<8x64xbf16>
    %cst_18 = arith.constant dense<0.000000e+00> : vector<8x64xf32>
    %23 = tpu.matmul %5, %22, %cst_18 {dimension_numbers = #tpu.dot_dimension_numbers<[1], [0], [0], [1], [0, 0, 1, 1], [], []>} : vector<8x8xbf16>, vector<8x64xbf16>, vector<8x64xf32> -> vector<8x64xf32>
    %c0_19 = arith.constant 0 : index
    %c0_20 = arith.constant 0 : index
    %24 = vector.load %arg9[%c0_19, %c0_20] : memref<1x64xf32, #tpu.memory_space<vmem>>, vector<1x64xf32>
    %25 = vector.broadcast %24 : vector<1x64xf32> to vector<8x64xf32>
    %26 = arith.addf %23, %25 : vector<8x64xf32>
    %cst_21 = arith.constant 0.000000e+00 : f32
    %27 = vector.broadcast %cst_21 : f32 to vector<8x64xf32>
    %28 = arith.maximumf %26, %27 : vector<8x64xf32>
    %29 = arith.truncf %28 : vector<8x64xf32> to vector<8x64xbf16>
    %c0_22 = arith.constant 0 : index
    %c0_23 = arith.constant 0 : index
    %30 = vector.load %arg10[%c0_22, %c0_23] : memref<256x64xbf16, #tpu.memory_space<vmem>>, vector<256x64xbf16>
    %cst_24 = arith.constant dense<0.000000e+00> : vector<8x64xf32>
    %31 = tpu.matmul %13, %30, %cst_24 {dimension_numbers = #tpu.dot_dimension_numbers<[1], [0], [0], [1], [0, 0, 1, 1], [], []>} : vector<8x256xbf16>, vector<256x64xbf16>, vector<8x64xf32> -> vector<8x64xf32>
    %c0_25 = arith.constant 0 : index
    %c0_26 = arith.constant 0 : index
    %32 = vector.load %arg11[%c0_25, %c0_26] : memref<256x64xbf16, #tpu.memory_space<vmem>>, vector<256x64xbf16>
    %cst_27 = arith.constant dense<0.000000e+00> : vector<8x64xf32>
    %33 = tpu.matmul %21, %32, %cst_27 {dimension_numbers = #tpu.dot_dimension_numbers<[1], [0], [0], [1], [0, 0, 1, 1], [], []>} : vector<8x256xbf16>, vector<256x64xbf16>, vector<8x64xf32> -> vector<8x64xf32>
    %34 = arith.addf %31, %33 : vector<8x64xf32>
    %c0_28 = arith.constant 0 : index
    %c0_29 = arith.constant 0 : index
    %35 = vector.load %arg12[%c0_28, %c0_29] : memref<64x64xbf16, #tpu.memory_space<vmem>>, vector<64x64xbf16>
    %cst_30 = arith.constant dense<0.000000e+00> : vector<8x64xf32>
    %36 = tpu.matmul %29, %35, %cst_30 {dimension_numbers = #tpu.dot_dimension_numbers<[1], [0], [0], [1], [0, 0, 1, 1], [], []>} : vector<8x64xbf16>, vector<64x64xbf16>, vector<8x64xf32> -> vector<8x64xf32>
    %37 = arith.addf %34, %36 : vector<8x64xf32>
    %c0_31 = arith.constant 0 : index
    %c0_32 = arith.constant 0 : index
    %38 = vector.load %arg13[%c0_31, %c0_32] : memref<1x64xf32, #tpu.memory_space<vmem>>, vector<1x64xf32>
    %39 = vector.broadcast %38 : vector<1x64xf32> to vector<8x64xf32>
    %40 = arith.addf %37, %39 : vector<8x64xf32>
    %cst_33 = arith.constant dense<0.000000e+00> : vector<8xf32>
    %41 = vector.multi_reduction <add>, %40, %cst_33 [1] : vector<8x64xf32> to vector<8xf32>
    %42 = vector.shape_cast %41 : vector<8xf32> to vector<8x1xf32>
    %cst_34 = arith.constant 6.400000e+01 : f32
    %43 = vector.broadcast %cst_34 : f32 to vector<8x1xf32>
    %44 = arith.divf %42, %43 : vector<8x1xf32>
    %45 = vector.broadcast %44 : vector<8x1xf32> to vector<8x64xf32>
    %46 = arith.subf %40, %45 : vector<8x64xf32>
    %47 = arith.mulf %46, %46 : vector<8x64xf32>
    %cst_35 = arith.constant dense<0.000000e+00> : vector<8xf32>
    %48 = vector.multi_reduction <add>, %47, %cst_35 [1] : vector<8x64xf32> to vector<8xf32>
    %49 = vector.shape_cast %48 : vector<8xf32> to vector<8x1xf32>
    %cst_36 = arith.constant 6.400000e+01 : f32
    %50 = vector.broadcast %cst_36 : f32 to vector<8x1xf32>
    %51 = arith.divf %49, %50 : vector<8x1xf32>
    %cst_37 = arith.constant 9.99999974E-6 : f32
    %52 = vector.broadcast %cst_37 : f32 to vector<8x1xf32>
    %53 = arith.addf %51, %52 : vector<8x1xf32>
    %54 = math.rsqrt %53 : vector<8x1xf32>
    %55 = vector.broadcast %54 : vector<8x1xf32> to vector<8x64xf32>
    %56 = arith.mulf %46, %55 : vector<8x64xf32>
    %c0_38 = arith.constant 0 : index
    %c0_39 = arith.constant 0 : index
    %57 = vector.load %arg14[%c0_38, %c0_39] : memref<1x64xf32, #tpu.memory_space<vmem>>, vector<1x64xf32>
    %58 = vector.broadcast %57 : vector<1x64xf32> to vector<8x64xf32>
    %59 = arith.mulf %56, %58 : vector<8x64xf32>
    %c0_40 = arith.constant 0 : index
    %c0_41 = arith.constant 0 : index
    %60 = vector.load %arg15[%c0_40, %c0_41] : memref<1x64xf32, #tpu.memory_space<vmem>>, vector<1x64xf32>
    %61 = vector.broadcast %60 : vector<1x64xf32> to vector<8x64xf32>
    %62 = arith.addf %59, %61 : vector<8x64xf32>
    %c0_42 = arith.constant 0 : index
    %c0_43 = arith.constant 0 : index
    %63 = vector.load %arg16[%c0_42, %c0_43] : memref<8x64xf32, #tpu.memory_space<vmem>>, vector<8x64xf32>
    tpu.vector_store %arg16[%c0_42, %c0_43], %62 {strides = array<i32>} : memref<8x64xf32, #tpu.memory_space<vmem>>, vector<8x64xf32>,
    return
  }
  func.func @transform_0(%arg0: i32) -> (i32, i32) {
    %c0_i32 = arith.constant 0 : i32
    %c0_i32_0 = arith.constant 0 : i32
    return %arg0, %c0_i32 : i32, i32
  }
  func.func @transform_1(%arg0: i32) -> (i32, i32) {
    %c0_i32 = arith.constant 0 : i32
    %c0_i32_0 = arith.constant 0 : i32
    return %arg0, %c0_i32 : i32, i32
  }
  func.func @transform_2(%arg0: i32) -> (i32, i32) {
    %c0_i32 = arith.constant 0 : i32
    %c0_i32_0 = arith.constant 0 : i32
    return %arg0, %c0_i32 : i32, i32
  }
  func.func @transform_3(%arg0: i32) -> (i32, i32) {
    %c0_i32 = arith.constant 0 : i32
    %c0_i32_0 = arith.constant 0 : i32
    %c0_i32_1 = arith.constant 0 : i32
    return %c0_i32, %c0_i32_0 : i32, i32
  }
  func.func @transform_4(%arg0: i32) -> (i32, i32) {
    %c0_i32 = arith.constant 0 : i32
    %c0_i32_0 = arith.constant 0 : i32
    %c0_i32_1 = arith.constant 0 : i32
    return %c0_i32, %c0_i32_0 : i32, i32
  }
  func.func @transform_5(%arg0: i32) -> (i32, i32) {
    %c0_i32 = arith.constant 0 : i32
    %c0_i32_0 = arith.constant 0 : i32
    %c0_i32_1 = arith.constant 0 : i32
    return %c0_i32, %c0_i32_0 : i32, i32
  }
  func.func @transform_6(%arg0: i32) -> (i32, i32) {
    %c0_i32 = arith.constant 0 : i32
    %c0_i32_0 = arith.constant 0 : i32
    %c0_i32_1 = arith.constant 0 : i32
    return %c0_i32, %c0_i32_0 : i32, i32
  }
  func.func @transform_7(%arg0: i32) -> (i32, i32) {
    %c0_i32 = arith.constant 0 : i32
    %c0_i32_0 = arith.constant 0 : i32
    %c0_i32_1 = arith.constant 0 : i32
    return %c0_i32, %c0_i32_0 : i32, i32
  }
  func.func @transform_8(%arg0: i32) -> (i32, i32) {
    %c0_i32 = arith.constant 0 : i32
    %c0_i32_0 = arith.constant 0 : i32
    %c0_i32_1 = arith.constant 0 : i32
    return %c0_i32, %c0_i32_0 : i32, i32
  }
  func.func @transform_9(%arg0: i32) -> (i32, i32) {
    %c0_i32 = arith.constant 0 : i32
    %c0_i32_0 = arith.constant 0 : i32
    %c0_i32_1 = arith.constant 0 : i32
    return %c0_i32, %c0_i32_0 : i32, i32
  }
  func.func @transform_10(%arg0: i32) -> (i32, i32) {
    %c0_i32 = arith.constant 0 : i32
    %c0_i32_0 = arith.constant 0 : i32
    %c0_i32_1 = arith.constant 0 : i32
    return %c0_i32, %c0_i32_0 : i32, i32
  }
  func.func @transform_11(%arg0: i32) -> (i32, i32) {
    %c0_i32 = arith.constant 0 : i32
    %c0_i32_0 = arith.constant 0 : i32
    %c0_i32_1 = arith.constant 0 : i32
    return %c0_i32, %c0_i32_0 : i32, i32
  }
  func.func @transform_12(%arg0: i32) -> (i32, i32) {
    %c0_i32 = arith.constant 0 : i32
    %c0_i32_0 = arith.constant 0 : i32
    %c0_i32_1 = arith.constant 0 : i32
    return %c0_i32, %c0_i32_0 : i32, i32
  }
  func.func @transform_13(%arg0: i32) -> (i32, i32) {
    %c0_i32 = arith.constant 0 : i32
    %c0_i32_0 = arith.constant 0 : i32
    %c0_i32_1 = arith.constant 0 : i32
    return %c0_i32, %c0_i32_0 : i32, i32
  }
  func.func @transform_14(%arg0: i32) -> (i32, i32) {
    %c0_i32 = arith.constant 0 : i32
    %c0_i32_0 = arith.constant 0 : i32
    %c0_i32_1 = arith.constant 0 : i32
    return %c0_i32, %c0_i32_0 : i32, i32
  }
  func.func @transform_15(%arg0: i32) -> (i32, i32) {
    %c0_i32 = arith.constant 0 : i32
    %c0_i32_0 = arith.constant 0 : i32
    return %arg0, %c0_i32 : i32, i32
  }
}

</mosaic_0001>

<bundles_post_ra>
// kernel: user_embedding_forward.1
= control target key start
LH: loop header
LB: loop body
LE: loop exit
PB: predicated region body
PF: predicated region fallthrough
CT: control target
= control target key end

     0   :  { %v1015_v2 = vmov 0   ;;  %vm287_vm0 = vcmask 1043456   ;;  %vm118_vm1 = vcmask 523264   ;;  %v1016_v24 = vmov 0.0   ;;  %s1303_s0 = inlined_call_operand.vmem [shape: f32[8,64], index: 0, kind: input, shape index: {}]   ;;  %s1304_s1 = inlined_call_operand.vmem [shape: f32[8,64], index: 1, kind: input, shape index: {}]   ;;  %s1305_s2 = inlined_call_operand.vmem [shape: f32[8,8], index: 2, kind: input, shape index: {}]   ;;  %s1306_s3 = inlined_call_operand.vmem [shape: bf16[64,256], index: 3, kind: input, shape index: {}]   ;;  %s1307_s4 = inlined_call_operand.vmem [shape: f32[1,256], index: 4, kind: input, shape index: {}]   ;;  %s1308_s5 = inlined_call_operand.vmem [shape: bf16[64,256], index: 5, kind: input, shape index: {}]   ;;  %s1309_s6 = inlined_call_operand.vmem [shape: f32[1,256], index: 6, kind: input, shape index: {}]   ;;  %s1310_s7 = inlined_call_operand.vmem [shape: bf16[8,64], index: 7, kind: input, shape index: {}]   ;;  %s1311_s8 = inlined_call_operand.vmem [shape: f32[1,64], index: 8, kind: input, shape index: {}]   ;;  %s1312_s9 = inlined_call_operand.vmem [shape: bf16[256,64], index: 9, kind: input, shape index: {}]   ;;  %s1313_s10 = inlined_call_operand.vmem [shape: bf16[256,64], index: 10, kind: input, shape index: {}]   ;;  %s1314_s11 = inlined_call_operand.vmem [shape: bf16[64,64], index: 11, kind: input, shape index: {}]   ;;  %s1315_s12 = inlined_call_operand.vmem [shape: f32[1,64], index: 12, kind: input, shape index: {}]   ;;  %s1316_s13 = inlined_call_operand.vmem [shape: f32[1,64], index: 13, kind: input, shape index: {}]   ;;  %s1317_s14 = inlined_call_operand.vmem [shape: f32[1,64], index: 14, kind: input, shape index: {}]   ;;  %s1318_s15 = inlined_call_operand.hbm [shape: f32[8,64], index: 15, kind: output, shape index: {}]  }
   0x1   :  { %v931_v0 = vld [vmem:[%s1306_s3 + $0x34] ss:$8 sps:$4 sm:$0xff]   ;;  %154 = vmatprep.mubr.bf16.mxu0 %v1015_v2  ;;  %262 = vmatprep.mubr.bf16.mxu1 %v1015_v2  ;;  %v935_v3 = vld [vmem:[%s1306_s3 + $0x30] ss:$8 sps:$4 sm:$0xff]   ;;  %v937_v5 = vld [vmem:[%s1306_s3 + $0x24] ss:$8 sps:$4 sm:$0xff]  }
   0x2   :  { %v933_v1 = vld [vmem:[%s1308_s5 + $0x34] ss:$8 sps:$4 sm:$0xff]   ;;  %130 = vmatprep.subr.bf16.mxu0 %v931_v0  ;;  %v936_v4 = vld [vmem:[%s1308_s5 + $0x30] ss:$8 sps:$4 sm:$0xff]   ;;  %v939_v6 = vld [vmem:[%s1308_s5 + $0x24] ss:$8 sps:$4 sm:$0xff]  }
   0x3   :  { %238 = vmatprep.subr.bf16.mxu1 %v933_v1  ;;  %131 = vmatpush1.bf16.msra.mxu0 %v935_v3  ;;  %v941_v7 = vld [vmem:[%s1306_s3 + $0x20] ss:$8 sps:$4 sm:$0xff]   ;;  %v943_v9 = vld [vmem:[%s1306_s3 + $0x14] ss:$8 sps:$4 sm:$0xff]   ;;  %v947_v11 = vld [vmem:[%s1306_s3 + $0x10] ss:$8 sps:$4 sm:$0xff]  }
   0x4   :  { %239 = vmatpush1.bf16.msra.mxu1 %v936_v4  ;;  %132 = vmatprep.subr.bf16.mxu0 %v937_v5  ;;  %v942_v8 = vld [vmem:[%s1308_s5 + $0x20] ss:$8 sps:$4 sm:$0xff]   ;;  %v945_v10 = vld [vmem:[%s1308_s5 + $0x14] ss:$8 sps:$4 sm:$0xff]   ;;  %v948_v12 = vld [vmem:[%s1308_s5 + $0x10] ss:$8 sps:$4 sm:$0xff]  }
   0x5   :  { %240 = vmatprep.subr.bf16.mxu1 %v939_v6  ;;  %v949_v13 = vld [vmem:[%s1306_s3 + $0x4] ss:$8 sps:$4 sm:$0xff]   ;;  %v953_v15 = vld [vmem:[%s1306_s3] ss:$8 sps:$4 sm:$0xff]   ;;  %v955_v19 = vld [vmem:[%s1313_s10 + $0x78] sm:$0xff]   ;;  %vm1017_vm2 = vmmov 0  }
   0x6   :  { %v951_v14 = vld [vmem:[%s1308_s5 + $0x4] ss:$8 sps:$4 sm:$0xff]   ;;  %v954_v16 = vld [vmem:[%s1308_s5] ss:$8 sps:$4 sm:$0xff]   ;;  %v956_v23 = vld [vmem:[%s1313_s10 + $0x38] sm:$0xff]   ;;  %vm283_vm3 = vcmask 64512  }
   0x7   :  { %133 = vmatpush1.bf16.msra.mxu0 %v941_v7  ;;  %v52_v17 = vld [vmem:[%s1303_s0] sm:$0xff]  ;;  %v957_v26 = vld [vmem:[%s1312_s9 + $0x78] sm:$0xff]   ;;  %v959_v27 = vld [vmem:[%s1313_s10 + $0x70] sm:$0xff]  }
   0x8   :  { %241 = vmatpush1.bf16.msra.mxu1 %v942_v8  ;;  %134 = vmatprep.subr.bf16.mxu0 %v943_v9  ;;  %v54_v18 = vld [vmem:[%s1304_s1] sm:$0xff]  ;;  %v53_v21 = vpack.c.bf16 %v52_v17, %v52_v17  ;;  %v960_v29 = vld [vmem:[%s1313_s10 + $0x30] sm:$0xff]   ;;  %v963_v30 = vld [vmem:[%s1313_s10 + $0x68] sm:$0xff]  }
   0x9   :  { %242 = vmatprep.subr.bf16.mxu1 %v945_v10  ;;  %v275_v20 = vld [vmem:[%s1310_s7] sm:$0xf]  ;;  %v55_v22 = vpack.c.bf16 %v54_v18, %v54_v18  ;;  %v958_v32 = vld [vmem:[%s1312_s9 + $0x38] sm:$0xff]   ;;  %v961_v33 = vld [vmem:[%s1312_s9 + $0x70] sm:$0xff]  }
   0xa   :  { %v289_v25 = vsel %vm287_vm0, %v275_v20, 0  ;;  %v56_v28 = vld [vmem:[%s1305_s2] sm:$0xff]  ;;  %v964_v34 = vld [vmem:[%s1313_s10 + $0x28] sm:$0xff]   ;;  %v962_v36 = vld [vmem:[%s1312_s9 + $0x30] sm:$0xff]  }
   0xb   :  { %135 = vmatpush1.bf16.msra.mxu0 %v947_v11  ;;  %v57_v31 = vpack.c.bf16 %v56_v28, %v56_v28  ;;  %v967_v35 = vld [vmem:[%s1313_s10 + $0x60] sm:$0xff]   ;;  %v965_v37 = vld [vmem:[%s1312_s9 + $0x68] sm:$0xff]   ;;  %v971_v39 = vld [vmem:[%s1313_s10 + $0x58] sm:$0xff]  }
   0xc   :  { %243 = vmatpush1.bf16.msra.mxu1 %v948_v12  ;;  %136 = vmatprep.subr.bf16.mxu0 %v949_v13  ;;  %v968_v38 = vld [vmem:[%s1313_s10 + $0x20] sm:$0xff]   ;;  %v966_v40 = vld [vmem:[%s1312_s9 + $0x28] sm:$0xff]   ;;  %v972_v42 = vld [vmem:[%s1313_s10 + $0x18] sm:$0xff]  }
   0xd   :  { %244 = vmatprep.subr.bf16.mxu1 %v951_v14  ;;  %v969_v41 = vld [vmem:[%s1312_s9 + $0x60] sm:$0xff]   ;;  %v975_v44 = vld [vmem:[%s1313_s10 + $0x50] sm:$0xff]   ;;  %v973_v45 = vld [vmem:[%s1312_s9 + $0x58] sm:$0xff]  }
   0xe   :  { %v970_v43 = vld [vmem:[%s1312_s9 + $0x20] sm:$0xff]   ;;  %v976_v46 = vld [vmem:[%s1313_s10 + $0x10] sm:$0xff]   ;;  %v974_v47 = vld [vmem:[%s1312_s9 + $0x18] sm:$0xff]  }
   0xf   :  { %137 = vmatpush1.bf16.msra.mxu0 %v953_v15  ;;  %v977_v48 = vld [vmem:[%s1312_s9 + $0x50] sm:$0xff]  }
  0x10   :  { %245 = vmatpush1.bf16.msra.mxu1 %v954_v16  ;;  %909 = vmatprep.subr.bf16.mxu0 %v1016_v24  ;;  %v978_v49 = vld [vmem:[%s1312_s9 + $0x10] sm:$0xff]  }
  0x11   :  { %860 = vmatprep.subr.bf16.mxu1 %v955_v19 }
  0x12   :  { %806 = vmatmul.mubr.msk.bf16.vlgmr.msra.gmra.mxu0 %vm118_vm1, %v53_v21 }
  0x13   :  { %815 = vmatmul.mubr.msk.bf16.vlgmr.msra.gmra.mxu1 %vm118_vm1, %v55_v22  ;;  %910 = vmatpush3.bf16.msra.mxu0 %v289_v25 }
  0x14   :  { %911 = vmatprep.mubr.msk.bf16.mxu0 %vm1017_vm2, %v1016_v24  ;;  %861 = vmatpush3.bf16.msra.mxu1 %v956_v23 }
  0x15   :  { %882 = vmatprep.subr.bf16.mxu0 %v957_v26  ;;  %862 = vmatprep.subr.bf16.mxu1 %v959_v27 }
  0x18   :  { %863 = vmatpush3.bf16.msra.mxu1 %v960_v29 }
  0x19   :  { %864 = vmatprep.subr.bf16.mxu1 %v963_v30 }
  0x1a   :  { %912 = vmatmul.mubr.msk.bf16.vlgmr.msra.gmra.mxu0 %vm283_vm3, %v57_v31 }
  0x1b   :  { %883 = vmatpush3.bf16.msra.mxu0 %v958_v32 }
  0x1c   :  { %884 = vmatprep.subr.bf16.mxu0 %v961_v33  ;;  %865 = vmatpush3.bf16.msra.mxu1 %v964_v34 }
  0x1d   :  { %866 = vmatprep.subr.bf16.mxu1 %v967_v35 }
  0x1f   :  { %885 = vmatpush3.bf16.msra.mxu0 %v962_v36 }
  0x20   :  { %886 = vmatprep.subr.bf16.mxu0 %v965_v37  ;;  %867 = vmatpush3.bf16.msra.mxu1 %v968_v38 }
  0x21   :  { %868 = vmatprep.subr.bf16.mxu1 %v971_v39 }
  0x23   :  { %887 = vmatpush3.bf16.msra.mxu0 %v966_v40 }
  0x24   :  { %888 = vmatprep.subr.bf16.mxu0 %v969_v41  ;;  %869 = vmatpush3.bf16.msra.mxu1 %v972_v42 }
  0x25   :  { %870 = vmatprep.subr.bf16.mxu1 %v975_v44 }
  0x27   :  { %889 = vmatpush3.bf16.msra.mxu0 %v970_v43 }
  0x28   :  { %890 = vmatprep.subr.bf16.mxu0 %v973_v45  ;;  %871 = vmatpush3.bf16.msra.mxu1 %v976_v46 }
  0x2b   :  { %891 = vmatpush3.bf16.msra.mxu0 %v974_v47 }
  0x2c   :  { %20 = vsyncpa [#allocation3], 0  ;;  %892 = vmatprep.subr.bf16.mxu0 %v977_v48  ;;  %v979_v50 = vld [vmem:[%s1313_s10 + $0x48] sm:$0xff]   ;;  %v983_v54 = vld [vmem:[%s1313_s10 + $0x40] sm:$0xff]   ;;  %v68_v58 = vlaneseq  ;;  %s1018_s22 = smov [#allocation2]  }
  0x2d   :  { %v980_v51 = vld [vmem:[%s1313_s10 + $0x8] sm:$0xff]   ;;  %872 = vmatprep.subr.bf16.mxu1 %v979_v50  ;;  %v984_v55 = vld [vmem:[%s1313_s10] sm:$0xff]   ;;  %v987_v23 = vld [vmem:[%s1314_s11 + $0x18] sm:$0xff]   ;;  %s790_s23 = sshll.u32 %s1018_s22, 4  ;;  %s791_s23 = int_to_ptr.vmem [resolvable:$true] %s790_s23 }
  0x2e   :  { %v981_v52 = vld [vmem:[%s1312_s9 + $0x48] sm:$0xff]   ;;  %873 = vmatpush3.bf16.msra.mxu1 %v980_v51  ;;  %v985_v56 = vld [vmem:[%s1312_s9 + $0x40] sm:$0xff]   ;;  %v69_v59 = vshrl.u32 %v68_v58, 7  ;;  %v988_v29 = vld [vmem:[%s1314_s11 + $0x10] sm:$0xff]   ;;  %s993_s2 = scalar_lea.vmem %s791_s23, 128  ;;  %p998_p1 = scmp.lt.s32.totalorder %s791_s23, %s791_s23 }
  0x2f   :  { %893 = vmatpush3.bf16.msra.mxu0 %v978_v49  ;;  %v982_v53 = vld [vmem:[%s1312_s9 + $0x8] sm:$0xff]   ;;  %874 = vmatprep.subr.bf16.mxu1 %v983_v54  ;;  %v986_v57 = vld [vmem:[%s1312_s9] sm:$0xff]   ;;  %p994_p0 = scmp.ne.s32.totalorder %s791_s23, %s993_s2  ;;  %p999_p2 = scmp.lt.s32.totalorder %s993_s2, %s993_s2 }
  0x30   :  { %894 = vmatprep.subr.bf16.mxu0 %v981_v52  ;;  %v70_v60 = vsub.s32 0, %v69_v59  ;;  %v66_v61 = vld [vmem:[%s1307_s4] sm:$0x3]  ;;  %v74_v63 = vsub.s32 1, %v69_v59  ;;  %v989_v33 = vld [vmem:[%s1314_s11 + $0x8] sm:$0xff]  }
  0x31   :  { %v175_v62 = vld [vmem:[%s1309_s6] sm:$0x3]  ;;  %p1000_p3 = por %p999_p2, %p998_p1 }
  0x32   :  { %875 = vmatpush3.bf16.msra.mxu1 %v984_v55  ;;  %v71_v0 = vrot.slane %v66_v61, %v70_v60  ;;  %v180_v1 = vrot.slane %v175_v62, %v70_v60  ;;  %v75_v2 = vrot.slane %v66_v61, %v74_v63  ;;  %v184_v3 = vrot.slane %v175_v62, %v74_v63  ;;  %v816_v28 = vld [vmem:[%s1311_s8] ss:$0 sm:$0xff] }
  0x33   :  { %895 = vmatpush3.bf16.msra.mxu0 %v982_v53  ;;  %915 = vmatprep.subr.bf16.mxu1 %v1016_v24  ;;  %v990_v35 = vld [vmem:[%s1314_s11] sm:$0xff]   ;;  %p1001_p4 = pnand %p1000_p3, %p994_p0 }
  0x34   :  { %896 = vmatprep.subr.bf16.mxu0 %v985_v56 }
  0x37   :  { %897 = vmatpush3.bf16.msra.mxu0 %v986_v57 }
  0xd2   :  { %v156_v4 = vpop.f32.mrf.mxu0 }
  0xd3   :  { %v264_v5 = vpop.f32.mrf.mxu1  ;;  %v157_v6 = vadd.f32 %v156_v4, %v71_v0  ;;  %v856_v0 = vld [vmem:[%s1316_s13] ss:$0 sm:$0xff] }
  0xd4   :  { %v265_v7 = vadd.f32 %v264_v5, %v180_v1  ;;  %v158_v8 = vpop.f32.mrf.mxu0 }
  0xd5   :  { %v266_v9 = vpop.f32.mrf.mxu1  ;;  %v163_v10 = vmax.f32 %v157_v6, 0.0  ;;  %v159_v11 = vadd.f32 %v158_v8, %v75_v2  ;;  %v857_v2 = vld [vmem:[%s1317_s14] ss:$0 sm:$0xff] }
  0xd6   :  { %v267_v12 = vadd.f32 %v266_v9, %v184_v3  ;;  %v271_v13 = vmax.f32 %v265_v7, 0.0  ;;  %v160_v15 = vpop.f32.mrf.mxu0 }
  0xd7   :  { %v268_v14 = vpop.f32.mrf.mxu1  ;;  %v164_v16 = vmax.f32 %v159_v11, 0.0  ;;  %v165_v18 = vpack.c.bf16 %v163_v10, %v163_v10 }
  0xd8   :  { %v272_v17 = vmax.f32 %v267_v12, 0.0  ;;  %v161_v20 = vpop.f32.mrf.mxu0  ;;  %v273_v25 = vpack.c.bf16 %v271_v13, %v271_v13 }
  0xd9   :  { %v269_v19 = vpop.f32.mrf.mxu1  ;;  %v166_v21 = vpack.c.bf16 %v164_v16, %v164_v16 }
  0xda   :  { %v274_v22 = vpack.c.bf16 %v272_v17, %v272_v17  ;;  %v325_v26 = vpop.f32.mrf.mxu0 }
  0xdb   :  { %661 = vmatprep.mubr.bf16.mxu0 %v166_v21  ;;  %v326_v31 = vadd.f32 %v816_v28, %v325_v26 }
  0xdc   :  { %525 = vmatprep.mubr.bf16.mxu1 %v274_v22  ;;  %662 = vmatmul.mubr.bf16.vlgmr.msra.gmra.mxu0 %v165_v18  ;;  %v913_v27 = vpop.f32.mrf.mxu0 }
  0xdd   :  { %526 = vmatmul.mubr.bf16.vlgmr.msra.gmra.mxu1 %v273_v25  ;;  %v331_v34 = vmax.f32 %v326_v31, 0.0 }
  0xde   :  { %916 = vmatpush3.bf16.msra.mxu1 %v987_v23  ;;  %923 = vmatprep.mubr.msk.bf16.mxu1 %vm1017_vm2, %v1016_v24  ;;  %v328_v30 = vpop.f32.mrf.mxu0 }
  0xdf   :  { %917 = vmatprep.subr.bf16.mxu1 %v1016_v24  ;;  %v332_v36 = vpack.c.bf16 %v331_v34, %v331_v34 }
  0xe0   :  { %v914_v32 = vpop.f32.mrf.mxu0 }
  0xe2   :  { %918 = vmatpush3.bf16.msra.mxu1 %v988_v29 }
  0xe3   :  { %919 = vmatprep.subr.bf16.mxu1 %v1016_v24 }
  0xe6   :  { %920 = vmatpush3.bf16.msra.mxu1 %v989_v33 }
  0xe7   :  { %921 = vmatprep.subr.bf16.mxu1 %v1016_v24  ;;  %v855_v24 = vld [vmem:[%s1315_s12] ss:$0 sm:$0xff] }
  0xea   :  { %922 = vmatpush3.bf16.msra.mxu1 %v990_v35 }
  0xed   :  { %924 = vmatmul.mubr.msk.bf16.vlgmr.msra.gmra.mxu1 %vm118_vm1, %v332_v36 }
 0x19c   :  { %v898_v38 = vpop.f32.mrf.mxu0 }
 0x19d   :  { %v876_v37 = vpop.f32.mrf.mxu1 }
 0x19e   :  { %v899_v40 = vpop.f32.mrf.mxu0 }
 0x19f   :  { %v877_v39 = vpop.f32.mrf.mxu1  ;;  %v900_v46 = vadd.f32 %v899_v40, %v898_v38 }
 0x1a0   :  { %v901_v42 = vpop.f32.mrf.mxu0  ;;  %v878_v45 = vadd.f32 %v877_v39, %v876_v37 }
 0x1a1   :  { %v879_v41 = vpop.f32.mrf.mxu1 }
 0x1a2   :  { %v902_v44 = vpop.f32.mrf.mxu0  ;;  %v664_v47 = vadd.f32 %v900_v46, %v878_v45 }
 0x1a3   :  { %v880_v43 = vpop.f32.mrf.mxu1 }
 0x1ad   :  { %v738_v48 = vpop.f32.mrf.mxu1 }
 0x1ae   :  { %v744_v49 = vadd.f32 %v738_v48, %v664_v47 }
 0x1af   :  { %v925_v50 = vpop.f32.mrf.mxu1 }
 0x1b0   :  { %v752_v51 = vadd.f32 %v855_v24, %v744_v49 }
 0x1b1   :  { %v741_v52 = vpop.f32.mrf.mxu1 }
 0x1b2   :  { %v753_v53 = vsel %vm118_vm1, %v752_v51, 0.0 }
 0x1b3   :  { %v926_v54 = vpop.f32.mrf.mxu1  ;;  %754 = vadd.xlane.f32.xlu0 %v753_v53 }
 0x23c   :  { %v755_v55 = vpop.xlane.xlu0 %754 }
 0x23d   :  { %v757_v56 = vmul.f32 0.015625, %v755_v55 }
 0x23f   :  { %v758_v57 = vsub.f32 %v752_v51, %v757_v56 }
 0x241   :  { %v759_v58 = vmul.f32 %v758_v57, %v758_v57 }
 0x243   :  { %v760_v59 = vsel %vm118_vm1, %v759_v58, 0.0 }
 0x244   :  { %761 = vadd.xlane.f32.xlu0 %v760_v59 }
 0x2cd   :  { %v762_v60 = vpop.xlane.xlu0 %761 }
 0x2ce   :  { %v763_v61 = vmul.f32 0.015625, %v762_v60 }
 0x2d0   :  { %v764_v62 = vadd.f32 1e-05, %v763_v61 }
 0x2d2   :  { %991 = vrsqrt.f32 %v764_v62 }
 0x2df   :  { %v992_v63 = vpop.eup %991 }
 0x2e0   :  { %v766_v1 = vmul.f32 %v992_v63, %v758_v57 }
 0x2e2   :  { %v774_v3 = vmul.f32 %v856_v0, %v766_v1 }
 0x2e4   :  { %v782_v4 = vadd.f32 %v857_v2, %v774_v3 }
 0x2e6   :  { %783 = vst.msk [vmem:[#allocation2] sm:$0xff] %vm118_vm1, %v782_v4 }
 0x2e7   :  { %1004 = shalt.err (!%p1001_p4)
}
 0x2e8   :  { %793 = dma.vmem_to_hbm [thread:$0]  %s791_s23, 128, %s1318_s15, [#allocation3]  }
 0x2e9   :  { %1013 = dma.done.wait [#allocation3], 128  }
 0x2ea   :  { %1014 = vsyncadd [#allocation3], 4294967168 }
 0x2eb   :  { %797 = vsyncpa [#allocation3], 1 }

</bundles_post_ra>
